<compile_context>
chip_gen: v7x
topology: tpu7x:2x2x1
jax: 0.10.0
libtpu: 0.0.40
codegen_flags: <defaults>
</compile_context>

<pallas_src>
import jax
import jax.numpy as jnp
from jax.experimental import pallas as pl
from jax.experimental.pallas import tpu as pltpu


EMBEDDING_DIM = 512
HIDDEN_DIM = 256
HEAD_PAD = 128          # lane-padded width for the w5 layer / w6 row
TILE_B = 1024           # max batch-tile rows per grid step


def _round_up(x, m):
    return ((x + m - 1) // m) * m


def _resident_spec(shape):
    # Full-array block whose block index never changes -> stays resident in VMEM.
    return pl.BlockSpec(shape, lambda i: (0,) * len(shape))


def _nbytes(a):
    n = 1
    for s in a.shape:
        n *= s
    return n * jnp.dtype(a.dtype).itemsize


def siamese_kernel(
    x_ref,                                             # [2, TB, D] bf16 (e1, e2 stacked)
    w1_ref, b1_ref, w2_ref, b2_ref, w3_ref, b3_ref,    # embedding_net (bf16 W, f32 b)
    w4_ref, b4_ref,                                    # similarity layer 1 (whole K=256 W)
    w5_ref, b5_ref,                                    # similarity layer 2 (padded to 128)
    w6row_ref, b6_ref,                                 # final Linear(64,1) as a padded row
    out_ref,                                           # [TB, 1] f32 similarity scores
):
    tb = x_ref.shape[1]
    d = x_ref.shape[2]

    # ---- both towers in a single pass over the shared embedding_net weights ----
    x = x_ref[...].reshape(2 * tb, d)                                   # bf16 [2*TB, D]
    h = jnp.maximum(
        jnp.dot(x, w1_ref[...], preferred_element_type=jnp.float32) + b1_ref[...], 0.0
    ).astype(jnp.bfloat16)
    h = jnp.maximum(
        jnp.dot(h, w2_ref[...], preferred_element_type=jnp.float32) + b2_ref[...], 0.0
    ).astype(jnp.bfloat16)
    t = jnp.dot(h, w3_ref[...], preferred_element_type=jnp.float32) + b3_ref[...]
                                                                        # f32 [2*TB, 128]
    t1 = t[:tb]                                                         # tower 1 output
    t2 = t[tb:]                                                         # tower 2 output

    diff = jnp.abs(t1 - t2).astype(jnp.bfloat16)                        # [TB, 128]
    prod = (t1 * t2).astype(jnp.bfloat16)                               # [TB, 128]

    # ---- similarity_net: single K=256 matmul (diff || prod along lanes) ----
    combined = jnp.concatenate([diff, prod], axis=-1)                   # bf16 [TB, 256]
    s = jnp.dot(combined, w4_ref[...], preferred_element_type=jnp.float32) + b4_ref[...]
    s = jnp.maximum(s, 0.0).astype(jnp.bfloat16)                        # [TB, 128]
    s = jnp.dot(s, w5_ref[...], preferred_element_type=jnp.float32) + b5_ref[...]
    s = jnp.maximum(s, 0.0)                                             # f32 [TB, 128]; cols 64+ are 0

    # Final Linear(64, 1): VPU multiply by padded w6 row + XLU lane-reduce.
    score = jnp.sum(s * w6row_ref[...], axis=-1, keepdims=True) + b6_ref[...]   # [TB, 1]
    out_ref[...] = jax.nn.sigmoid(score)


def init_params(key, embedding_dim=EMBEDDING_DIM, hidden_dim=HIDDEN_DIM):
    """Deterministic synthetic parameters (PyTorch-default-like uniform init).

    Weights are [in_features, out_features] so y = x @ W + b.
    """
    dims = [
        (embedding_dim, hidden_dim),        # embedding_net
        (hidden_dim, hidden_dim),
        (hidden_dim, hidden_dim // 2),
        (hidden_dim, hidden_dim // 2),      # similarity_net
        (hidden_dim // 2, 64),
        (64, 1),
    ]
    params = []
    for (fan_in, fan_out) in dims:
        key, kw, kb = jax.random.split(key, 3)
        bound = 1.0 / jnp.sqrt(fan_in)
        w = jax.random.uniform(kw, (fan_in, fan_out), jnp.float32, -bound, bound)
        b = jax.random.uniform(kb, (1, fan_out), jnp.float32, -bound, bound)
        params += [w, b]
    return params


def prepare_params(params):
    """Cast matmul weights to bf16; zero-pad w5/b5 to lane width 128; turn w6
    into a zero-padded [1, 128] row (kept f32: it feeds the VPU, not the MXU)."""
    (w1, b1, w2, b2, w3, b3, w4, b4, w5, b5, w6, b6) = params

    w5p = jnp.zeros((w5.shape[0], HEAD_PAD), jnp.float32).at[:, : w5.shape[1]].set(w5)
    b5p = jnp.zeros((1, HEAD_PAD), jnp.float32).at[:, : b5.shape[1]].set(b5)
    w6row = jnp.zeros((1, HEAD_PAD), jnp.float32).at[0, : w6.shape[0]].set(w6[:, 0])

    bf = lambda w: w.astype(jnp.bfloat16)
    return (bf(w1), b1, bf(w2), b2, bf(w3), b3,
            bf(w4), b4, bf(w5p), b5p, w6row, b6)


@jax.jit
def siamese_forward(e1, e2, *prepared):
    B, D = e1.shape
    H = HIDDEN_DIM

    # Batch tile: multiple of 8 sublanes, capped at TILE_B, and sized so the
    # grid has >= 2 steps whenever B > 8 (v7x dual-TensorCore sharding of the
    # "parallel" batch axis).
    tb = min(TILE_B, _round_up(pl.cdiv(B, 2), 8))
    b_pad = _round_up(B, tb)
    if b_pad != B:
        pad = b_pad - B
        e1 = jnp.pad(e1, ((0, pad), (0, 0)))
        e2 = jnp.pad(e2, ((0, pad), (0, 0)))

    # Stack the two towers' inputs so the kernel runs embedding_net once per tile.
    x = jnp.stack([e1, e2], axis=0).astype(jnp.bfloat16)      # [2, B_pad, D]

    grid = (b_pad // tb,)

    in_specs = [pl.BlockSpec((2, tb, D), lambda i: (0, i, 0))]
    in_specs += [_resident_spec(p.shape) for p in prepared]

    flops = (2 * (2 * b_pad) * (D * H + H * H + H * (H // 2))   # embedding net (2 towers)
             + 2 * b_pad * (H * HEAD_PAD + HEAD_PAD * HEAD_PAD) # w4 (K=256), w5p
             + 2 * b_pad * HEAD_PAD)                            # final mul + lane reduce
    bytes_accessed = (_nbytes(x) + b_pad * 4
                      + sum(_nbytes(p) for p in prepared))
    cost = pl.CostEstimate(flops=flops,
                           transcendentals=b_pad,
                           bytes_accessed=bytes_accessed)

    out = pl.pallas_call(
        siamese_kernel,
        out_shape=jax.ShapeDtypeStruct((b_pad, 1), jnp.float32),
        grid=grid,
        in_specs=in_specs,
        out_specs=pl.BlockSpec((tb, 1), lambda i: (i, 0)),
        compiler_params=pltpu.CompilerParams(dimension_semantics=("parallel",)),
        cost_estimate=cost,
    )(x, *prepared)

    # Drop batch padding; output is already [B_pad, 1].
    return out[:B]


def siamese_forward_ref(e1, e2, *params):
    """Pure-JAX f32 reference for correctness checking."""
    (w1, b1, w2, b2, w3, b3, w4, b4, w5, b5, w6, b6) = params

    def emb(x):
        h = jnp.maximum(x @ w1 + b1, 0.0)
        h = jnp.maximum(h @ w2 + b2, 0.0)
        return h @ w3 + b3

    t1, t2 = emb(e1), emb(e2)
    combined = jnp.concatenate([jnp.abs(t1 - t2), t1 * t2], axis=1)
    s = jnp.maximum(combined @ w4 + b4, 0.0)
    s = jnp.maximum(s @ w5 + b5, 0.0)
    return jax.nn.sigmoid(s @ w6 + b6)


if __name__ == "__main__":
    key = jax.random.PRNGKey(0)
    k_params, k_e1, k_e2 = jax.random.split(key, 3)

    params = init_params(k_params)
    prepared = prepare_params(params)

    # Small case (matches the module's [batch, embedding_dim] interface).
    batch = 2
    e1 = jax.random.normal(k_e1, (batch, EMBEDDING_DIM), jnp.float32)
    e2 = jax.random.normal(k_e2, (batch, EMBEDDING_DIM), jnp.float32)

    out = jax.block_until_ready(siamese_forward(e1, e2, *prepared))
    ref = siamese_forward_ref(e1, e2, *params)
    assert out.shape == (batch, 1), out.shape
    assert bool(jnp.all(jnp.isfinite(out)))
    # bf16 matmul operands -> relaxed tolerance vs the f32 reference.
    assert jnp.allclose(out, ref, atol=2e-2, rtol=2e-2), (out, ref)

    # Larger case: exercises batch padding and a multi-step (pipelined,
    # dual-TensorCore-shardable) grid.
    kb1, kb2 = jax.random.split(k_e1)
    big = 300
    E1 = jax.random.normal(kb1, (big, EMBEDDING_DIM), jnp.float32)
    E2 = jax.random.normal(kb2, (big, EMBEDDING_DIM), jnp.float32)
    out_b = jax.block_until_ready(siamese_forward(E1, E2, *prepared))
    ref_b = siamese_forward_ref(E1, E2, *params)
    assert out_b.shape == (big, 1), out_b.shape
    assert jnp.allclose(out_b, ref_b, atol=2e-2, rtol=2e-2)

    print("KERNEL_OK")
</pallas_src>

<mosaic_0001>
module attributes {stable_mosaic.version = 11 : i64} {
  func.func @siamese_kernel(%arg0: i32, %arg1: memref<2x8x512xbf16, #tpu.memory_space<vmem>>, %arg2: memref<512x256xbf16, #tpu.memory_space<vmem>>, %arg3: memref<1x256xf32, #tpu.memory_space<vmem>>, %arg4: memref<256x256xbf16, #tpu.memory_space<vmem>>, %arg5: memref<1x256xf32, #tpu.memory_space<vmem>>, %arg6: memref<256x128xbf16, #tpu.memory_space<vmem>>, %arg7: memref<1x128xf32, #tpu.memory_space<vmem>>, %arg8: memref<256x128xbf16, #tpu.memory_space<vmem>>, %arg9: memref<1x128xf32, #tpu.memory_space<vmem>>, %arg10: memref<128x128xbf16, #tpu.memory_space<vmem>>, %arg11: memref<1x128xf32, #tpu.memory_space<vmem>>, %arg12: memref<1x128xf32, #tpu.memory_space<vmem>>, %arg13: memref<1x1xf32, #tpu.memory_space<vmem>>, %arg14: memref<8x1xf32, #tpu.memory_space<vmem>>) attributes {dimension_semantics = [#tpu.dimension_semantics<parallel>], iteration_bounds = array<i64: 1>, scalar_prefetch = 0 : i64, scratch_operands = 0 : i64, tpu.core_type = #tpu.core_type<tc>, window_params = [{transform_indices = @transform_0, window_bounds = array<i64: 2, 8, 512>}, {pipeline_mode = #tpu.pipeline_mode<synchronous>, transform_indices = @transform_1, window_bounds = array<i64: 512, 256>}, {pipeline_mode = #tpu.pipeline_mode<synchronous>, transform_indices = @transform_2, window_bounds = array<i64: 1, 256>}, {pipeline_mode = #tpu.pipeline_mode<synchronous>, transform_indices = @transform_3, window_bounds = array<i64: 256, 256>}, {pipeline_mode = #tpu.pipeline_mode<synchronous>, transform_indices = @transform_4, window_bounds = array<i64: 1, 256>}, {pipeline_mode = #tpu.pipeline_mode<synchronous>, transform_indices = @transform_5, window_bounds = array<i64: 256, 128>}, {pipeline_mode = #tpu.pipeline_mode<synchronous>, transform_indices = @transform_6, window_bounds = array<i64: 1, 128>}, {pipeline_mode = #tpu.pipeline_mode<synchronous>, transform_indices = @transform_7, window_bounds = array<i64: 256, 128>}, {pipeline_mode = #tpu.pipeline_mode<synchronous>, transform_indices = @transform_8, window_bounds = array<i64: 1, 128>}, {pipeline_mode = #tpu.pipeline_mode<synchronous>, transform_indices = @transform_9, window_bounds = array<i64: 128, 128>}, {pipeline_mode = #tpu.pipeline_mode<synchronous>, transform_indices = @transform_10, window_bounds = array<i64: 1, 128>}, {pipeline_mode = #tpu.pipeline_mode<synchronous>, transform_indices = @transform_11, window_bounds = array<i64: 1, 128>}, {pipeline_mode = #tpu.pipeline_mode<synchronous>, transform_indices = @transform_12, window_bounds = array<i64: 1, 1>}, {transform_indices = @transform_13, window_bounds = array<i64: 8, 1>}]} {
    %c0 = arith.constant 0 : index
    %c0_0 = arith.constant 0 : index
    %c0_1 = arith.constant 0 : index
    %0 = vector.load %arg1[%c0, %c0_0, %c0_1] : memref<2x8x512xbf16, #tpu.memory_space<vmem>>, vector<2x8x512xbf16>
    %1 = vector.shape_cast %0 : vector<2x8x512xbf16> to vector<16x512xbf16>
    %c0_2 = arith.constant 0 : index
    %c0_3 = arith.constant 0 : index
    %2 = vector.load %arg2[%c0_2, %c0_3] : memref<512x256xbf16, #tpu.memory_space<vmem>>, vector<512x256xbf16>
    %cst = arith.constant dense<0.000000e+00> : vector<16x256xf32>
    %3 = tpu.matmul %1, %2, %cst {dimension_numbers = #tpu.dot_dimension_numbers<[1], [0], [0], [1], [0, 0, 1, 1], [], []>} : vector<16x512xbf16>, vector<512x256xbf16>, vector<16x256xf32> -> vector<16x256xf32>
    %c0_4 = arith.constant 0 : index
    %c0_5 = arith.constant 0 : index
    %4 = vector.load %arg3[%c0_4, %c0_5] : memref<1x256xf32, #tpu.memory_space<vmem>>, vector<1x256xf32>
    %5 = vector.broadcast %4 : vector<1x256xf32> to vector<16x256xf32>
    %6 = arith.addf %3, %5 : vector<16x256xf32>
    %cst_6 = arith.constant 0.000000e+00 : f32
    %7 = vector.broadcast %cst_6 : f32 to vector<16x256xf32>
    %8 = arith.maximumf %6, %7 : vector<16x256xf32>
    %9 = arith.truncf %8 : vector<16x256xf32> to vector<16x256xbf16>
    %c0_7 = arith.constant 0 : index
    %c0_8 = arith.constant 0 : index
    %10 = vector.load %arg4[%c0_7, %c0_8] : memref<256x256xbf16, #tpu.memory_space<vmem>>, vector<256x256xbf16>
    %cst_9 = arith.constant dense<0.000000e+00> : vector<16x256xf32>
    %11 = tpu.matmul %9, %10, %cst_9 {dimension_numbers = #tpu.dot_dimension_numbers<[1], [0], [0], [1], [0, 0, 1, 1], [], []>} : vector<16x256xbf16>, vector<256x256xbf16>, vector<16x256xf32> -> vector<16x256xf32>
    %c0_10 = arith.constant 0 : index
    %c0_11 = arith.constant 0 : index
    %12 = vector.load %arg5[%c0_10, %c0_11] : memref<1x256xf32, #tpu.memory_space<vmem>>, vector<1x256xf32>
    %13 = vector.broadcast %12 : vector<1x256xf32> to vector<16x256xf32>
    %14 = arith.addf %11, %13 : vector<16x256xf32>
    %cst_12 = arith.constant 0.000000e+00 : f32
    %15 = vector.broadcast %cst_12 : f32 to vector<16x256xf32>
    %16 = arith.maximumf %14, %15 : vector<16x256xf32>
    %17 = arith.truncf %16 : vector<16x256xf32> to vector<16x256xbf16>
    %c0_13 = arith.constant 0 : index
    %c0_14 = arith.constant 0 : index
    %18 = vector.load %arg6[%c0_13, %c0_14] : memref<256x128xbf16, #tpu.memory_space<vmem>>, vector<256x128xbf16>
    %cst_15 = arith.constant dense<0.000000e+00> : vector<16x128xf32>
    %19 = tpu.matmul %17, %18, %cst_15 {dimension_numbers = #tpu.dot_dimension_numbers<[1], [0], [0], [1], [0, 0, 1, 1], [], []>} : vector<16x256xbf16>, vector<256x128xbf16>, vector<16x128xf32> -> vector<16x128xf32>
    %c0_16 = arith.constant 0 : index
    %c0_17 = arith.constant 0 : index
    %20 = vector.load %arg7[%c0_16, %c0_17] : memref<1x128xf32, #tpu.memory_space<vmem>>, vector<1x128xf32>
    %21 = vector.broadcast %20 : vector<1x128xf32> to vector<16x128xf32>
    %22 = arith.addf %19, %21 : vector<16x128xf32>
    %23 = vector.extract_strided_slice %22 {offsets = [0, 0], sizes = [8, 128], strides = [1, 1]} : vector<16x128xf32> to vector<8x128xf32>
    %24 = vector.extract_strided_slice %22 {offsets = [8, 0], sizes = [8, 128], strides = [1, 1]} : vector<16x128xf32> to vector<8x128xf32>
    %25 = arith.subf %23, %24 : vector<8x128xf32>
    %26 = math.absf %25 : vector<8x128xf32>
    %27 = arith.truncf %26 : vector<8x128xf32> to vector<8x128xbf16>
    %28 = arith.mulf %23, %24 : vector<8x128xf32>
    %29 = arith.truncf %28 : vector<8x128xf32> to vector<8x128xbf16>
    %30 = tpu.concatenate %27, %29 in 1 : vector<8x128xbf16>, vector<8x128xbf16> -> vector<8x256xbf16>
    %c0_18 = arith.constant 0 : index
    %c0_19 = arith.constant 0 : index
    %31 = vector.load %arg8[%c0_18, %c0_19] : memref<256x128xbf16, #tpu.memory_space<vmem>>, vector<256x128xbf16>
    %cst_20 = arith.constant dense<0.000000e+00> : vector<8x128xf32>
    %32 = tpu.matmul %30, %31, %cst_20 {dimension_numbers = #tpu.dot_dimension_numbers<[1], [0], [0], [1], [0, 0, 1, 1], [], []>} : vector<8x256xbf16>, vector<256x128xbf16>, vector<8x128xf32> -> vector<8x128xf32>
    %c0_21 = arith.constant 0 : index
    %c0_22 = arith.constant 0 : index
    %33 = vector.load %arg9[%c0_21, %c0_22] : memref<1x128xf32, #tpu.memory_space<vmem>>, vector<1x128xf32>
    %34 = vector.broadcast %33 : vector<1x128xf32> to vector<8x128xf32>
    %35 = arith.addf %32, %34 : vector<8x128xf32>
    %cst_23 = arith.constant 0.000000e+00 : f32
    %36 = vector.broadcast %cst_23 : f32 to vector<8x128xf32>
    %37 = arith.maximumf %35, %36 : vector<8x128xf32>
    %38 = arith.truncf %37 : vector<8x128xf32> to vector<8x128xbf16>
    %c0_24 = arith.constant 0 : index
    %c0_25 = arith.constant 0 : index
    %39 = vector.load %arg10[%c0_24, %c0_25] : memref<128x128xbf16, #tpu.memory_space<vmem>>, vector<128x128xbf16>
    %cst_26 = arith.constant dense<0.000000e+00> : vector<8x128xf32>
    %40 = tpu.matmul %38, %39, %cst_26 {dimension_numbers = #tpu.dot_dimension_numbers<[1], [0], [0], [1], [0, 0, 1, 1], [], []>} : vector<8x128xbf16>, vector<128x128xbf16>, vector<8x128xf32> -> vector<8x128xf32>
    %c0_27 = arith.constant 0 : index
    %c0_28 = arith.constant 0 : index
    %41 = vector.load %arg11[%c0_27, %c0_28] : memref<1x128xf32, #tpu.memory_space<vmem>>, vector<1x128xf32>
    %42 = vector.broadcast %41 : vector<1x128xf32> to vector<8x128xf32>
    %43 = arith.addf %40, %42 : vector<8x128xf32>
    %cst_29 = arith.constant 0.000000e+00 : f32
    %44 = vector.broadcast %cst_29 : f32 to vector<8x128xf32>
    %45 = arith.maximumf %43, %44 : vector<8x128xf32>
    %c0_30 = arith.constant 0 : index
    %c0_31 = arith.constant 0 : index
    %46 = vector.load %arg12[%c0_30, %c0_31] : memref<1x128xf32, #tpu.memory_space<vmem>>, vector<1x128xf32>
    %47 = vector.broadcast %46 : vector<1x128xf32> to vector<8x128xf32>
    %48 = arith.mulf %45, %47 : vector<8x128xf32>
    %cst_32 = arith.constant dense<0.000000e+00> : vector<8xf32>
    %49 = vector.multi_reduction <add>, %48, %cst_32 [1] : vector<8x128xf32> to vector<8xf32>
    %50 = vector.shape_cast %49 : vector<8xf32> to vector<8x1xf32>
    %c0_33 = arith.constant 0 : index
    %c0_34 = arith.constant 0 : index
    %51 = vector.load %arg13[%c0_33, %c0_34] : memref<1x1xf32, #tpu.memory_space<vmem>>, vector<1x1xf32>
    %52 = vector.broadcast %51 : vector<1x1xf32> to vector<8x1xf32>
    %53 = arith.addf %50, %52 : vector<8x1xf32>
    %54 = arith.negf %53 : vector<8x1xf32>
    %55 = math.exp %54 : vector<8x1xf32>
    %cst_35 = arith.constant 1.000000e+00 : f32
    %56 = vector.broadcast %cst_35 : f32 to vector<8x1xf32>
    %57 = arith.addf %56, %55 : vector<8x1xf32>
    %58 = arith.divf %56, %57 : vector<8x1xf32>
    %c0_36 = arith.constant 0 : index
    %c0_37 = arith.constant 0 : index
    %59 = vector.load %arg14[%c0_36, %c0_37] : memref<8x1xf32, #tpu.memory_space<vmem>>, vector<8x1xf32>
    tpu.vector_store %arg14[%c0_36, %c0_37], %58 {strides = array<i32>} : memref<8x1xf32, #tpu.memory_space<vmem>>, vector<8x1xf32>,
    return
  }
  func.func @transform_0(%arg0: i32) -> (i32, i32, i32) {
    %c0_i32 = arith.constant 0 : i32
    %c0_i32_0 = arith.constant 0 : i32
    %c0_i32_1 = arith.constant 0 : i32
    return %c0_i32, %arg0, %c0_i32_0 : i32, i32, i32
  }
  func.func @transform_1(%arg0: i32) -> (i32, i32) {
    %c0_i32 = arith.constant 0 : i32
    %c0_i32_0 = arith.constant 0 : i32
    %c0_i32_1 = arith.constant 0 : i32
    return %c0_i32, %c0_i32_0 : i32, i32
  }
  func.func @transform_2(%arg0: i32) -> (i32, i32) {
    %c0_i32 = arith.constant 0 : i32
    %c0_i32_0 = arith.constant 0 : i32
    %c0_i32_1 = arith.constant 0 : i32
    return %c0_i32, %c0_i32_0 : i32, i32
  }
  func.func @transform_3(%arg0: i32) -> (i32, i32) {
    %c0_i32 = arith.constant 0 : i32
    %c0_i32_0 = arith.constant 0 : i32
    %c0_i32_1 = arith.constant 0 : i32
    return %c0_i32, %c0_i32_0 : i32, i32
  }
  func.func @transform_4(%arg0: i32) -> (i32, i32) {
    %c0_i32 = arith.constant 0 : i32
    %c0_i32_0 = arith.constant 0 : i32
    %c0_i32_1 = arith.constant 0 : i32
    return %c0_i32, %c0_i32_0 : i32, i32
  }
  func.func @transform_5(%arg0: i32) -> (i32, i32) {
    %c0_i32 = arith.constant 0 : i32
    %c0_i32_0 = arith.constant 0 : i32
    %c0_i32_1 = arith.constant 0 : i32
    return %c0_i32, %c0_i32_0 : i32, i32
  }
  func.func @transform_6(%arg0: i32) -> (i32, i32) {
    %c0_i32 = arith.constant 0 : i32
    %c0_i32_0 = arith.constant 0 : i32
    %c0_i32_1 = arith.constant 0 : i32
    return %c0_i32, %c0_i32_0 : i32, i32
  }
  func.func @transform_7(%arg0: i32) -> (i32, i32) {
    %c0_i32 = arith.constant 0 : i32
    %c0_i32_0 = arith.constant 0 : i32
    %c0_i32_1 = arith.constant 0 : i32
    return %c0_i32, %c0_i32_0 : i32, i32
  }
  func.func @transform_8(%arg0: i32) -> (i32, i32) {
    %c0_i32 = arith.constant 0 : i32
    %c0_i32_0 = arith.constant 0 : i32
    %c0_i32_1 = arith.constant 0 : i32
    return %c0_i32, %c0_i32_0 : i32, i32
  }
  func.func @transform_9(%arg0: i32) -> (i32, i32) {
    %c0_i32 = arith.constant 0 : i32
    %c0_i32_0 = arith.constant 0 : i32
    %c0_i32_1 = arith.constant 0 : i32
    return %c0_i32, %c0_i32_0 : i32, i32
  }
  func.func @transform_10(%arg0: i32) -> (i32, i32) {
    %c0_i32 = arith.constant 0 : i32
    %c0_i32_0 = arith.constant 0 : i32
    %c0_i32_1 = arith.constant 0 : i32
    return %c0_i32, %c0_i32_0 : i32, i32
  }
  func.func @transform_11(%arg0: i32) -> (i32, i32) {
    %c0_i32 = arith.constant 0 : i32
    %c0_i32_0 = arith.constant 0 : i32
    %c0_i32_1 = arith.constant 0 : i32
    return %c0_i32, %c0_i32_0 : i32, i32
  }
  func.func @transform_12(%arg0: i32) -> (i32, i32) {
    %c0_i32 = arith.constant 0 : i32
    %c0_i32_0 = arith.constant 0 : i32
    %c0_i32_1 = arith.constant 0 : i32
    return %c0_i32, %c0_i32_0 : i32, i32
  }
  func.func @transform_13(%arg0: i32) -> (i32, i32) {
    %c0_i32 = arith.constant 0 : i32
    %c0_i32_0 = arith.constant 0 : i32
    return %arg0, %c0_i32 : i32, i32
  }
}

</mosaic_0001>

<bundles_post_ra>
// kernel: siamese_forward.1
= control target key start
LH: loop header
LB: loop body
LE: loop exit
PB: predicated region body
PF: predicated region fallthrough
CT: control target
= control target key end

     0   :  { %s2114_s0 = inlined_call_operand.vmem [shape: bf16[2,8,512], index: 0, kind: input, shape index: {}]   ;;  %s2115_s1 = inlined_call_operand.hbm [shape: bf16[512,256], index: 1, kind: input, shape index: {}]   ;;  %s2116_s2 = inlined_call_operand.vmem [shape: f32[1,256], index: 2, kind: input, shape index: {}]   ;;  %s2117_s3 = inlined_call_operand.hbm [shape: bf16[256,256], index: 3, kind: input, shape index: {}]   ;;  %s2118_s4 = inlined_call_operand.vmem [shape: f32[1,256], index: 4, kind: input, shape index: {}]   ;;  %s2119_s5 = inlined_call_operand.vmem [shape: bf16[256,128], index: 5, kind: input, shape index: {}]   ;;  %s2120_s6 = inlined_call_operand.vmem [shape: f32[1,128], index: 6, kind: input, shape index: {}]   ;;  %s2121_s7 = inlined_call_operand.hbm [shape: bf16[256,128], index: 7, kind: input, shape index: {}]   ;;  %s2122_s8 = inlined_call_operand.vmem [shape: f32[1,128], index: 8, kind: input, shape index: {}]   ;;  %s2123_s9 = inlined_call_operand.hbm [shape: bf16[128,128], index: 9, kind: input, shape index: {}]   ;;  %s2124_s10 = inlined_call_operand.vmem [shape: f32[1,128], index: 10, kind: input, shape index: {}]   ;;  %s2125_s11 = inlined_call_operand.vmem [shape: f32[1,128], index: 11, kind: input, shape index: {}]   ;;  %s2126_s12 = inlined_call_operand.<no memory space> [shape: f32[1,1], index: 12, kind: input, shape index: {}]   ;;  %s2127_s13 = inlined_call_operand.vmem [shape: f32[8,1], index: 13, kind: output, shape index: {}]  }
   0x1   :  { %v18_v0 = vstv %s2126_s12 }
   0x2   :  { %19 = vst [vmem:[#allocation2] sm:$0x1] %v18_v0 }
   0x3   :  { %20 = vsyncpa [#allocation4], 0 }
   0x4   :  { %21 = vsyncpa [#allocation6], 0 }
   0x5   :  { %22 = vsyncpa [#allocation9], 0  ;;  %s1895_s27 = smov [#allocation5]   ;;  %s1896_s29 = smov [#allocation3]  }
   0x6   :  { %s44_s28 = sshll.u32 %s1895_s27, 4  ;;  %s30_s30 = sshll.u32 %s1896_s29, 4  ;;  %s45_s28 = int_to_ptr.vmem [resolvable:$true] %s44_s28  ;;  %s1978_s30 = int_to_ptr.vmem [resolvable:$true] %s30_s30 }
   0x7   :  { %s1801_s16 = scalar_lea.hbm %s2117_s3, 4096 }
   0x8   :  { %p1802_p0 = scmp.ne.s32.totalorder %s2117_s3, %s1801_s16  ;;  %p1805_p1 = scmp.lt.u32.totalorder %s1801_s16, %s2117_s3 }
   0xa   :  { %p1807_p2 = pnand %p1805_p1, %p1802_p0 }
   0xc   :  { %1810 = shalt.err (!%p1807_p2)
}
   0xd   :  { %s1811_s20 = scalar_lea.vmem %s45_s28, 4096  ;;  %p1816_p4 = scmp.lt.s32.totalorder %s45_s28, %s45_s28 }
   0xe   :  { %p1812_p3 = scmp.ne.s32.totalorder %s45_s28, %s1811_s20  ;;  %p1817_p5 = scmp.lt.s32.totalorder %s1811_s20, %s1811_s20 }
  0x10   :  { %p1818_p6 = por %p1817_p5, %p1816_p4 }
  0x12   :  { %p1819_p7 = pnand %p1818_p6, %p1812_p3 }
  0x14   :  { %1822 = shalt.err (!%p1819_p7)
}
  0x15   :  { %s1897_s21 = smov 128   ;;  %s1898_s22 = smov 8  }
  0x16   :  { %50 = dma.hbm_to_vmem [thread:$0]  %s2117_s3, 4096, %s45_s28, [#allocation6], %s1897_s21, %s1897_s21, %s1898_s22  }
  0x17   :  { %s1823_s27 = scalar_lea.hbm %s2115_s1, 8192 }
  0x18   :  { %p1824_p8 = scmp.ne.s32.totalorder %s2115_s1, %s1823_s27  ;;  %p1827_p9 = scmp.lt.u32.totalorder %s1823_s27, %s2115_s1 }
  0x1a   :  { %p1829_p10 = pnand %p1827_p9, %p1824_p8 }
  0x1c   :  { %1832 = shalt.err (!%p1829_p10)
}
  0x1d   :  { %s1833_s17 = scalar_lea.vmem %s1978_s30, 8192  ;;  %p1838_p12 = scmp.lt.s32.totalorder %s1978_s30, %s1978_s30 }
  0x1e   :  { %p1834_p11 = scmp.ne.s32.totalorder %s1978_s30, %s1833_s17  ;;  %p1839_p13 = scmp.lt.s32.totalorder %s1833_s17, %s1833_s17 }
  0x20   :  { %p1840_p0 = por %p1839_p13, %p1838_p12 }
  0x22   :  { %p1841_p1 = pnand %p1840_p0, %p1834_p11 }
  0x24   :  { %1844 = shalt.err (!%p1841_p1)
}
  0x25   :  { %36 = dma.hbm_to_vmem [thread:$0]  %s2115_s1, 8192, %s1978_s30, [#allocation4], %s1897_s21, %s1897_s21, %s1898_s22  }
  0x26   :  { %s1899_s18 = smov [#allocation7]   ;;  %s1845_s23 = scalar_lea.hbm %s2121_s7, 2048 }
  0x27   :  { %s62_s12 = sshll.u32 %s1899_s18, 4  ;;  %p1846_p2 = scmp.ne.s32.totalorder %s2121_s7, %s1845_s23  ;;  %s63_s12 = int_to_ptr.vmem [resolvable:$true] %s62_s12 }
  0x28   :  { %p1849_p3 = scmp.lt.u32.totalorder %s1845_s23, %s2121_s7 }
  0x2a   :  { %p1851_p4 = pnand %p1849_p3, %p1846_p2 }
  0x2c   :  { %1854 = shalt.err (!%p1851_p4)
}
  0x2d   :  { %s1855_s29 = scalar_lea.vmem %s63_s12, 2048  ;;  %p1860_p6 = scmp.lt.s32.totalorder %s63_s12, %s63_s12 }
  0x2e   :  { %p1856_p5 = scmp.ne.s32.totalorder %s63_s12, %s1855_s29  ;;  %p1861_p7 = scmp.lt.s32.totalorder %s1855_s29, %s1855_s29 }
  0x30   :  { %p1862_p8 = por %p1861_p7, %p1860_p6 }
  0x32   :  { %p1863_p9 = pnand %p1862_p8, %p1856_p5 }
  0x34   :  { %1866 = shalt.err (!%p1863_p9)
}
  0x35   :  { %s1900_s1 = smov 64   ;;  %s1901_s30 = smov 4  }
  0x36   :  { %68 = dma.hbm_to_vmem [thread:$0]  %s2121_s7, 2048, %s63_s12, [#allocation6], %s1900_s1, %s1900_s1, %s1901_s30  }
  0x37   :  { %s1902_s14 = smov [#allocation8]   ;;  %s1867_s3 = scalar_lea.hbm %s2123_s9, 1024 }
  0x38   :  { %s76_s15 = sshll.u32 %s1902_s14, 4  ;;  %p1868_p10 = scmp.ne.s32.totalorder %s2123_s9, %s1867_s3  ;;  %s77_s15 = int_to_ptr.vmem [resolvable:$true] %s76_s15 }
  0x39   :  { %p1871_p11 = scmp.lt.u32.totalorder %s1867_s3, %s2123_s9 }
  0x3b   :  { %p1873_p12 = pnand %p1871_p11, %p1868_p10 }
  0x3d   :  { %1876 = shalt.err (!%p1873_p12)
}
  0x3e   :  { %s1877_s23 = scalar_lea.vmem %s77_s15, 1024  ;;  %p1882_p0 = scmp.lt.s32.totalorder %s77_s15, %s77_s15 }
  0x3f   :  { %p1878_p13 = scmp.ne.s32.totalorder %s77_s15, %s1877_s23  ;;  %p1883_p1 = scmp.lt.s32.totalorder %s1877_s23, %s1877_s23 }
  0x41   :  { %p1884_p2 = por %p1883_p1, %p1882_p0 }
  0x43   :  { %p1885_p3 = pnand %p1884_p2, %p1878_p13 }
  0x45   :  { %1888 = shalt.err (!%p1885_p3)
}
  0x46   :  { %82 = dma.hbm_to_vmem [thread:$0]  %s2123_s9, 1024, %s77_s15, [#allocation9], %s1900_s1, %s1900_s1, %s1901_s30  }
  0x47   :  { %1889 = dma.done.wait [#allocation4], 8192  }
  0x48   :  { %1890 = vsyncadd [#allocation4], 4294959104 }
  0x49   :  { %1891 = dma.done.wait [#allocation6], 6144  }
  0x4a   :  { %1892 = vsyncadd [#allocation6], 4294961152 }
  0x4b   :  { %1893 = dma.done.wait [#allocation9], 1024  }
  0x4c   :  { %1894 = vsyncadd [#allocation9], 4294966272  ;;  %v1607_v1 = vld [vmem:[#allocation3 + $0x4] ss:$8 sps:$4 sm:$0xff]   ;;  %v1609_v2 = vld [vmem:[#allocation3] ss:$8 sps:$4 sm:$0xff]  }
  0x4d   :  { %522 = vmatprep.subr.bf16.mxu0 %v1607_v1  ;;  %v1610_v3 = vld [vmem:[#allocation3 + $0x14] ss:$8 sps:$4 sm:$0xff]   ;;  %v1612_v4 = vld [vmem:[#allocation3 + $0x10] ss:$8 sps:$4 sm:$0xff]   ;;  %v1613_v5 = vld [vmem:[#allocation3 + $0x24] ss:$8 sps:$4 sm:$0xff]  }
  0x4e   :  { %523 = vmatpush1.bf16.msra.mxu0 %v1609_v2  ;;  %v1615_v6 = vld [vmem:[#allocation3 + $0x20] ss:$8 sps:$4 sm:$0xff]   ;;  %v1616_v7 = vld [vmem:[#allocation3 + $0x34] ss:$8 sps:$4 sm:$0xff]   ;;  %v1618_v8 = vld [vmem:[#allocation3 + $0x30] ss:$8 sps:$4 sm:$0xff]  }
  0x4f   :  { %524 = vmatprep.subr.bf16.mxu0 %v1610_v3  ;;  %v1619_v9 = vld [vmem:[#allocation3 + $0x44] ss:$8 sps:$4 sm:$0xff]   ;;  %v1621_v10 = vld [vmem:[#allocation3 + $0x40] ss:$8 sps:$4 sm:$0xff]   ;;  %v1622_v11 = vld [vmem:[#allocation3 + $0x54] ss:$8 sps:$4 sm:$0xff]  }
  0x50   :  { %v1624_v12 = vld [vmem:[#allocation3 + $0x50] ss:$8 sps:$4 sm:$0xff]   ;;  %v1625_v13 = vld [vmem:[#allocation3 + $0x64] ss:$8 sps:$4 sm:$0xff]   ;;  %v1627_v15 = vld [vmem:[#allocation3 + $0x60] ss:$8 sps:$4 sm:$0xff]  }
  0x51   :  { %v1657_v14 = vld [vmem:[%s2114_s0 + $0x4] ss:$16 sps:$4 sm:$0xff]   ;;  %v1655_v43 = vld [vmem:[%s2114_s0] ss:$16 sps:$4 sm:$0xff]   ;;  %v1708_v49 = vld [vmem:[%s2114_s0 + $0xc] ss:$16 sps:$4 sm:$0xff]  }
  0x52   :  { %525 = vmatpush1.bf16.msra.mxu0 %v1612_v4  ;;  %v1628_v16 = vld [vmem:[#allocation3 + $0x74] ss:$8 sps:$4 sm:$0xff]   ;;  %554 = vmatprep.mubr.bf16.mxu0 %v1657_v14  ;;  %v1630_v17 = vld [vmem:[#allocation3 + $0x70] ss:$8 sps:$4 sm:$0xff]   ;;  %v1631_v18 = vld [vmem:[#allocation3 + $0x84] ss:$8 sps:$4 sm:$0xff]  }
  0x53   :  { %526 = vmatprep.subr.bf16.mxu0 %v1613_v5  ;;  %v1633_v19 = vld [vmem:[#allocation3 + $0x80] ss:$8 sps:$4 sm:$0xff]   ;;  %v1634_v20 = vld [vmem:[#allocation3 + $0x94] ss:$8 sps:$4 sm:$0xff]   ;;  %v1636_v21 = vld [vmem:[#allocation3 + $0x90] ss:$8 sps:$4 sm:$0xff]  }
  0x54   :  { %v1637_v22 = vld [vmem:[#allocation3 + $0xa4] ss:$8 sps:$4 sm:$0xff]   ;;  %v1639_v23 = vld [vmem:[#allocation3 + $0xa0] ss:$8 sps:$4 sm:$0xff]   ;;  %v1640_v24 = vld [vmem:[#allocation3 + $0xb4] ss:$8 sps:$4 sm:$0xff]  }
  0x55   :  { %v1642_v25 = vld [vmem:[#allocation3 + $0xb0] ss:$8 sps:$4 sm:$0xff]   ;;  %v1643_v26 = vld [vmem:[#allocation3 + $0xc4] ss:$8 sps:$4 sm:$0xff]   ;;  %v1711_v28 = vld [vmem:[#allocation5] ss:$8 sps:$4 sm:$0xff]  }
  0x56   :  { %527 = vmatpush1.bf16.msra.mxu0 %v1615_v6  ;;  %v1709_v27 = vld [vmem:[#allocation5 + $0x4] ss:$8 sps:$4 sm:$0xff]   ;;  %v1645_v29 = vld [vmem:[#allocation3 + $0xc0] ss:$8 sps:$4 sm:$0xff]   ;;  %v1712_v30 = vld [vmem:[#allocation5 + $0x14] ss:$8 sps:$4 sm:$0xff]  }
  0x57   :  { %528 = vmatprep.subr.bf16.mxu0 %v1616_v7  ;;  %v1646_v31 = vld [vmem:[#allocation3 + $0xd4] ss:$8 sps:$4 sm:$0xff]   ;;  %818 = vmatprep.subr.bf16.mxu1 %v1709_v27  ;;  %v1714_v32 = vld [vmem:[#allocation5 + $0x10] ss:$8 sps:$4 sm:$0xff]   ;;  %v1715_v33 = vld [vmem:[#allocation5 + $0x24] ss:$8 sps:$4 sm:$0xff]  }
  0x58   :  { %819 = vmatpush1.bf16.msra.mxu1 %v1711_v28  ;;  %v1648_v34 = vld [vmem:[#allocation3 + $0xd0] ss:$8 sps:$4 sm:$0xff]   ;;  %v1649_v35 = vld [vmem:[#allocation3 + $0xe4] ss:$8 sps:$4 sm:$0xff]   ;;  %v1717_v36 = vld [vmem:[#allocation5 + $0x20] ss:$8 sps:$4 sm:$0xff]  }
  0x59   :  { %820 = vmatprep.subr.bf16.mxu1 %v1712_v30  ;;  %v1718_v37 = vld [vmem:[#allocation5 + $0x34] ss:$8 sps:$4 sm:$0xff]   ;;  %v1651_v38 = vld [vmem:[#allocation3 + $0xe0] ss:$8 sps:$4 sm:$0xff]   ;;  %v1720_v40 = vld [vmem:[#allocation5 + $0x30] ss:$8 sps:$4 sm:$0xff]  }
  0x5a   :  { %529 = vmatpush1.bf16.msra.mxu0 %v1618_v8  ;;  %v1652_v39 = vld [vmem:[#allocation3 + $0xf4] ss:$8 sps:$4 sm:$0xff]   ;;  %v1721_v41 = vld [vmem:[#allocation5 + $0x44] ss:$8 sps:$4 sm:$0xff]   ;;  %v1654_v42 = vld [vmem:[#allocation3 + $0xf0] ss:$8 sps:$4 sm:$0xff]  }
  0x5b   :  { %530 = vmatprep.subr.bf16.mxu0 %v1619_v9  ;;  %v1660_v44 = vld [vmem:[#allocation3 + $0x104] ss:$8 sps:$4 sm:$0xff]   ;;  %v1658_v45 = vld [vmem:[#allocation3 + $0x100] ss:$8 sps:$4 sm:$0xff]   ;;  %v1663_v47 = vld [vmem:[#allocation3 + $0x114] ss:$8 sps:$4 sm:$0xff]  }
  0x5c   :  { %821 = vmatpush1.bf16.msra.mxu1 %v1714_v32  ;;  %v1723_v46 = vld [vmem:[#allocation5 + $0x40] ss:$8 sps:$4 sm:$0xff]   ;;  %v1724_v48 = vld [vmem:[#allocation5 + $0x54] ss:$8 sps:$4 sm:$0xff]   ;;  %v1726_v50 = vld [vmem:[#allocation5 + $0x50] ss:$8 sps:$4 sm:$0xff]  }
  0x5d   :  { %822 = vmatprep.subr.bf16.mxu1 %v1715_v33  ;;  %v1727_v51 = vld [vmem:[#allocation5 + $0x64] ss:$8 sps:$4 sm:$0xff]   ;;  %v1661_v52 = vld [vmem:[#allocation3 + $0x110] ss:$8 sps:$4 sm:$0xff]   ;;  %v1729_v54 = vld [vmem:[#allocation5 + $0x60] ss:$8 sps:$4 sm:$0xff]  }
  0x5e   :  { %531 = vmatpush1.bf16.msra.mxu0 %v1621_v10  ;;  %v1666_v53 = vld [vmem:[#allocation3 + $0x124] ss:$8 sps:$4 sm:$0xff]   ;;  %v1730_v55 = vld [vmem:[#allocation5 + $0x74] ss:$8 sps:$4 sm:$0xff]   ;;  %v1664_v56 = vld [vmem:[#allocation3 + $0x120] ss:$8 sps:$4 sm:$0xff]  }
  0x5f   :  { %532 = vmatprep.subr.bf16.mxu0 %v1622_v11  ;;  %v1669_v57 = vld [vmem:[#allocation3 + $0x134] ss:$8 sps:$4 sm:$0xff]   ;;  %v1732_v58 = vld [vmem:[#allocation5 + $0x70] ss:$8 sps:$4 sm:$0xff]   ;;  %v1733_v59 = vld [vmem:[#allocation5 + $0x84] ss:$8 sps:$4 sm:$0xff]  }
  0x60   :  { %823 = vmatpush1.bf16.msra.mxu1 %v1717_v36  ;;  %v1667_v60 = vld [vmem:[#allocation3 + $0x130] ss:$8 sps:$4 sm:$0xff]   ;;  %v1672_v61 = vld [vmem:[#allocation3 + $0x144] ss:$8 sps:$4 sm:$0xff]   ;;  %v1735_v62 = vld [vmem:[#allocation5 + $0x80] ss:$8 sps:$4 sm:$0xff]  }
  0x61   :  { %824 = vmatprep.subr.bf16.mxu1 %v1718_v37  ;;  %v1736_v63 = vld [vmem:[#allocation5 + $0x94] ss:$8 sps:$4 sm:$0xff]   ;;  %v1670_v0 = vld [vmem:[#allocation3 + $0x140] ss:$8 sps:$4 sm:$0xff]   ;;  %v1738_v2 = vld [vmem:[#allocation5 + $0x90] ss:$8 sps:$4 sm:$0xff]  }
  0x62   :  { %533 = vmatpush1.bf16.msra.mxu0 %v1624_v12  ;;  %v1675_v1 = vld [vmem:[#allocation3 + $0x154] ss:$8 sps:$4 sm:$0xff]   ;;  %v1739_v3 = vld [vmem:[#allocation5 + $0xa4] ss:$8 sps:$4 sm:$0xff]   ;;  %v1673_v4 = vld [vmem:[#allocation3 + $0x150] ss:$8 sps:$4 sm:$0xff]  }
  0x63   :  { %534 = vmatprep.subr.bf16.mxu0 %v1625_v13  ;;  %v1678_v5 = vld [vmem:[#allocation3 + $0x164] ss:$8 sps:$4 sm:$0xff]   ;;  %v1741_v6 = vld [vmem:[#allocation5 + $0xa0] ss:$8 sps:$4 sm:$0xff]   ;;  %v1742_v7 = vld [vmem:[#allocation5 + $0xb4] ss:$8 sps:$4 sm:$0xff]  }
  0x64   :  { %825 = vmatpush1.bf16.msra.mxu1 %v1720_v40  ;;  %v1676_v8 = vld [vmem:[#allocation3 + $0x160] ss:$8 sps:$4 sm:$0xff]   ;;  %v1681_v9 = vld [vmem:[#allocation3 + $0x174] ss:$8 sps:$4 sm:$0xff]   ;;  %v1744_v10 = vld [vmem:[#allocation5 + $0xb0] ss:$8 sps:$4 sm:$0xff]  }
  0x65   :  { %826 = vmatprep.subr.bf16.mxu1 %v1721_v41  ;;  %v1745_v11 = vld [vmem:[#allocation5 + $0xc4] ss:$8 sps:$4 sm:$0xff]   ;;  %v1679_v12 = vld [vmem:[#allocation3 + $0x170] ss:$8 sps:$4 sm:$0xff]   ;;  %v1747_v14 = vld [vmem:[#allocation5 + $0xc0] ss:$8 sps:$4 sm:$0xff]  }
  0x66   :  { %535 = vmatpush1.bf16.msra.mxu0 %v1627_v15  ;;  %v1684_v13 = vld [vmem:[#allocation3 + $0x184] ss:$8 sps:$4 sm:$0xff]   ;;  %v1748_v15 = vld [vmem:[#allocation5 + $0xd4] ss:$8 sps:$4 sm:$0xff]   ;;  %v1700_v28 = vld [vmem:[#allocation3 + $0x1e0] ss:$8 sps:$4 sm:$0xff]  }
  0x67   :  { %536 = vmatprep.subr.bf16.mxu0 %v1628_v16  ;;  %v1682_v16 = vld [vmem:[#allocation3 + $0x180] ss:$8 sps:$4 sm:$0xff]   ;;  %v1702_v27 = vld [vmem:[#allocation3 + $0x1e4] ss:$8 sps:$4 sm:$0xff]   ;;  %v1703_v30 = vld [vmem:[#allocation3 + $0x1f0] ss:$8 sps:$4 sm:$0xff]  }
  0x68   :  { %827 = vmatpush1.bf16.msra.mxu1 %v1723_v46  ;;  %v1750_v32 = vld [vmem:[#allocation5 + $0xd0] ss:$8 sps:$4 sm:$0xff]   ;;  %v1751_v33 = vld [vmem:[#allocation5 + $0xe4] ss:$8 sps:$4 sm:$0xff]   ;;  %v170_v41 = vld [vmem:[%s2116_s2] sm:$0x3] }
  0x69   :  { %828 = vmatprep.subr.bf16.mxu1 %v1724_v48  ;;  %v1756_v36 = vld [vmem:[#allocation5 + $0xf0] ss:$8 sps:$4 sm:$0xff]   ;;  %v1757_v37 = vld [vmem:[%s2119_s5 + $0x40] sm:$0xff]   ;;  %vm1904_vm0 = vmmov 0   ;;  %vm1361_vm1 = vcmask 7168  }
  0x6a   :  { %537 = vmatpush1.bf16.msra.mxu0 %v1630_v17  ;;  %v1687_v17 = vld [vmem:[#allocation3 + $0x194] ss:$8 sps:$4 sm:$0xff]  }
  0x6b   :  { %538 = vmatprep.subr.bf16.mxu0 %v1631_v18  ;;  %v1685_v18 = vld [vmem:[#allocation3 + $0x190] ss:$8 sps:$4 sm:$0xff]  }
  0x6c   :  { %829 = vmatpush1.bf16.msra.mxu1 %v1726_v50 }
  0x6d   :  { %830 = vmatprep.subr.bf16.mxu1 %v1727_v51 }
  0x6e   :  { %539 = vmatpush1.bf16.msra.mxu0 %v1633_v19  ;;  %v1690_v19 = vld [vmem:[#allocation3 + $0x1a4] ss:$8 sps:$4 sm:$0xff]  }
  0x6f   :  { %540 = vmatprep.subr.bf16.mxu0 %v1634_v20  ;;  %v1688_v20 = vld [vmem:[#allocation3 + $0x1a0] ss:$8 sps:$4 sm:$0xff]  }
  0x70   :  { %831 = vmatpush1.bf16.msra.mxu1 %v1729_v54 }
  0x71   :  { %832 = vmatprep.subr.bf16.mxu1 %v1730_v55 }
  0x72   :  { %541 = vmatpush1.bf16.msra.mxu0 %v1636_v21  ;;  %v1693_v21 = vld [vmem:[#allocation3 + $0x1b4] ss:$8 sps:$4 sm:$0xff]  }
  0x73   :  { %542 = vmatprep.subr.bf16.mxu0 %v1637_v22  ;;  %v1691_v22 = vld [vmem:[#allocation3 + $0x1b0] ss:$8 sps:$4 sm:$0xff]  }
  0x74   :  { %833 = vmatpush1.bf16.msra.mxu1 %v1732_v58 }
  0x75   :  { %834 = vmatprep.subr.bf16.mxu1 %v1733_v59  ;;  %v1758_v59 = vld [vmem:[%s2119_s5] sm:$0xff]  }
  0x76   :  { %543 = vmatpush1.bf16.msra.mxu0 %v1639_v23  ;;  %v1696_v23 = vld [vmem:[#allocation3 + $0x1c4] ss:$8 sps:$4 sm:$0xff]  }
  0x77   :  { %544 = vmatprep.subr.bf16.mxu0 %v1640_v24  ;;  %v1694_v24 = vld [vmem:[#allocation3 + $0x1c0] ss:$8 sps:$4 sm:$0xff]  }
  0x78   :  { %835 = vmatpush1.bf16.msra.mxu1 %v1735_v62  ;;  %v1761_v62 = vld [vmem:[%s2119_s5 + $0x50] sm:$0xff]  }
  0x79   :  { %836 = vmatprep.subr.bf16.mxu1 %v1736_v63  ;;  %v1762_v63 = vld [vmem:[%s2119_s5 + $0x10] sm:$0xff]  }
  0x7a   :  { %545 = vmatpush1.bf16.msra.mxu0 %v1642_v25  ;;  %v1699_v25 = vld [vmem:[#allocation3 + $0x1d4] ss:$8 sps:$4 sm:$0xff]  }
  0x7b   :  { %546 = vmatprep.subr.bf16.mxu0 %v1643_v26  ;;  %v1697_v26 = vld [vmem:[#allocation3 + $0x1d0] ss:$8 sps:$4 sm:$0xff]  }
  0x7c   :  { %837 = vmatpush1.bf16.msra.mxu1 %v1738_v2  ;;  %v1765_v2 = vld [vmem:[%s2119_s5 + $0x60] sm:$0xff]  }
  0x7d   :  { %838 = vmatprep.subr.bf16.mxu1 %v1739_v3  ;;  %v1766_v3 = vld [vmem:[%s2119_s5 + $0x20] sm:$0xff]  }
  0x7e   :  { %547 = vmatpush1.bf16.msra.mxu0 %v1645_v29  ;;  %v1705_v29 = vld [vmem:[#allocation3 + $0x1f4] ss:$8 sps:$4 sm:$0xff]  }
  0x7f   :  { %548 = vmatprep.subr.bf16.mxu0 %v1646_v31  ;;  %v1706_v31 = vld [vmem:[%s2114_s0 + $0x8] ss:$16 sps:$4 sm:$0xff]  }
  0x80   :  { %839 = vmatpush1.bf16.msra.mxu1 %v1741_v6  ;;  %v1769_v6 = vld [vmem:[%s2119_s5 + $0x70] sm:$0xff]  }
  0x81   :  { %840 = vmatprep.subr.bf16.mxu1 %v1742_v7  ;;  %v1770_v7 = vld [vmem:[%s2119_s5 + $0x30] sm:$0xff]  }
  0x82   :  { %549 = vmatpush1.bf16.msra.mxu0 %v1648_v34  ;;  %v1753_v34 = vld [vmem:[#allocation5 + $0xe0] ss:$8 sps:$4 sm:$0xff]  }
  0x83   :  { %550 = vmatprep.subr.bf16.mxu0 %v1649_v35  ;;  %v1754_v35 = vld [vmem:[#allocation5 + $0xf4] ss:$8 sps:$4 sm:$0xff]  }
  0x84   :  { %841 = vmatpush1.bf16.msra.mxu1 %v1744_v10  ;;  %v1773_v10 = vld [vmem:[#allocation7 + $0x40] sm:$0xff]  }
  0x85   :  { %842 = vmatprep.subr.bf16.mxu1 %v1745_v11  ;;  %v646_v11 = vld [vmem:[%s2118_s4] sm:$0x3] }
  0x86   :  { %551 = vmatpush1.bf16.msra.mxu0 %v1651_v38  ;;  %v172_v38 = vlaneseq }
  0x87   :  { %552 = vmatprep.subr.bf16.mxu0 %v1652_v39 }
  0x88   :  { %843 = vmatpush1.bf16.msra.mxu1 %v1747_v14  ;;  %v173_v39 = vshrl.u32 %v172_v38, 7  ;;  %v1784_v38 = vld [vmem:[#allocation7 + $0x28] sm:$0xff]  }
  0x89   :  { %844 = vmatprep.subr.bf16.mxu1 %v1748_v15 }
  0x8a   :  { %553 = vmatpush1.bf16.msra.mxu0 %v1654_v42  ;;  %v174_v40 = vsub.s32 0, %v173_v39  ;;  %v178_v42 = vsub.s32 1, %v173_v39  ;;  %v1785_v39 = vld [vmem:[#allocation7 + $0x70] sm:$0xff]  }
  0x8b   :  { %565 = vmatprep.subr.bf16.mxu0 %v1660_v44 }
  0x8c   :  { %845 = vmatpush1.bf16.msra.mxu1 %v1750_v32  ;;  %v179_v44 = vrot.slane %v170_v41, %v178_v42  ;;  %v1778_v32 = vld [vmem:[#allocation7 + $0x10] sm:$0xff]  }
  0x8d   :  { %555 = vmatmul.mubr.bf16.vlgmr.msra.gmra.mrb[0].mxu0 %v1655_v43  ;;  %846 = vmatprep.subr.bf16.mxu1 %v1751_v33  ;;  %v175_v43 = vrot.slane %v170_v41, %v174_v40  ;;  %v1779_v33 = vld [vmem:[#allocation7 + $0x58] sm:$0xff]  }
  0x8e   :  { %566 = vmatpush1.bf16.msra.mxu0 %v1658_v45  ;;  %597 = vmatprep.mubr.bf16.mxu0 %v1708_v49  ;;  %v1787_v41 = vld [vmem:[#allocation7 + $0x78] sm:$0xff]  }
  0x8f   :  { %567 = vmatprep.subr.bf16.mxu0 %v1663_v47 }
  0x90   :  { %847 = vmatpush1.bf16.msra.mxu1 %v1753_v34  ;;  %v1780_v34 = vld [vmem:[#allocation7 + $0x18] sm:$0xff]  }
  0x91   :  { %848 = vmatprep.subr.bf16.mxu1 %v1754_v35  ;;  %v1781_v35 = vld [vmem:[#allocation7 + $0x60] sm:$0xff]  }
  0x92   :  { %568 = vmatpush1.bf16.msra.mxu0 %v1661_v52 }
  0x93   :  { %569 = vmatprep.subr.bf16.mxu0 %v1666_v53 }
  0x94   :  { %849 = vmatpush1.bf16.msra.mxu1 %v1756_v36  ;;  %v1782_v36 = vld [vmem:[#allocation7 + $0x20] sm:$0xff]  }
  0x95   :  { %1516 = vmatprep.subr.bf16.mxu1 %v1757_v37  ;;  %v1783_v37 = vld [vmem:[#allocation7 + $0x68] sm:$0xff]  }
  0x96   :  { %570 = vmatpush1.bf16.msra.mxu0 %v1664_v56 }
  0x97   :  { %571 = vmatprep.subr.bf16.mxu0 %v1669_v57 }
  0x9a   :  { %572 = vmatpush1.bf16.msra.mxu0 %v1667_v60  ;;  %v1759_v60 = vld [vmem:[%s2119_s5 + $0x48] sm:$0xff]  }
  0x9b   :  { %573 = vmatprep.subr.bf16.mxu0 %v1672_v61  ;;  %v1760_v61 = vld [vmem:[%s2119_s5 + $0x8] sm:$0xff]  }
  0x9e   :  { %574 = vmatpush1.bf16.msra.mxu0 %v1670_v0  ;;  %v1763_v0 = vld [vmem:[%s2119_s5 + $0x58] sm:$0xff]  }
  0x9f   :  { %575 = vmatprep.subr.bf16.mxu0 %v1675_v1  ;;  %v1764_v1 = vld [vmem:[%s2119_s5 + $0x18] sm:$0xff]  }
  0xa2   :  { %576 = vmatpush1.bf16.msra.mxu0 %v1673_v4  ;;  %v1767_v4 = vld [vmem:[%s2119_s5 + $0x68] sm:$0xff]  }
  0xa3   :  { %577 = vmatprep.subr.bf16.mxu0 %v1678_v5  ;;  %v1768_v5 = vld [vmem:[%s2119_s5 + $0x28] sm:$0xff]  }
  0xa6   :  { %578 = vmatpush1.bf16.msra.mxu0 %v1676_v8  ;;  %v1771_v8 = vld [vmem:[%s2119_s5 + $0x78] sm:$0xff]  }
  0xa7   :  { %579 = vmatprep.subr.bf16.mxu0 %v1681_v9  ;;  %v1772_v9 = vld [vmem:[%s2119_s5 + $0x38] sm:$0xff]  }
  0xaa   :  { %580 = vmatpush1.bf16.msra.mxu0 %v1679_v12  ;;  %v651_v12 = vrot.slane %v646_v11, %v174_v40  ;;  %v1786_v40 = vld [vmem:[#allocation7 + $0x30] sm:$0xff]  }
  0xab   :  { %581 = vmatprep.subr.bf16.mxu0 %v1684_v13  ;;  %v655_v13 = vrot.slane %v646_v11, %v178_v42  ;;  %v1788_v42 = vld [vmem:[#allocation7 + $0x38] sm:$0xff]  }
  0xac   :  { %v1504_v11 = vld [vmem:[%s2124_s10] ss:$0 sm:$0xff] }
  0xae   :  { %582 = vmatpush1.bf16.msra.mxu0 %v1682_v16 }
  0xaf   :  { %583 = vmatprep.subr.bf16.mxu0 %v1687_v17 }
  0xb2   :  { %584 = vmatpush1.bf16.msra.mxu0 %v1685_v18 }
  0xb3   :  { %585 = vmatprep.subr.bf16.mxu0 %v1690_v19 }
  0xb6   :  { %586 = vmatpush1.bf16.msra.mxu0 %v1688_v20 }
  0xb7   :  { %587 = vmatprep.subr.bf16.mxu0 %v1693_v21 }
  0xba   :  { %588 = vmatpush1.bf16.msra.mxu0 %v1691_v22 }
  0xbb   :  { %589 = vmatprep.subr.bf16.mxu0 %v1696_v23 }
  0xbe   :  { %590 = vmatpush1.bf16.msra.mxu0 %v1694_v24 }
  0xbf   :  { %591 = vmatprep.subr.bf16.mxu0 %v1699_v25 }
  0xc2   :  { %592 = vmatpush1.bf16.msra.mxu0 %v1697_v26 }
  0xc3   :  { %593 = vmatprep.subr.bf16.mxu0 %v1702_v27 }
  0xc6   :  { %594 = vmatpush1.bf16.msra.mxu0 %v1700_v28  ;;  %v1774_v28 = vld [vmem:[#allocation7] sm:$0xff]  }
  0xc7   :  { %595 = vmatprep.subr.bf16.mxu0 %v1705_v29  ;;  %v1775_v29 = vld [vmem:[#allocation7 + $0x48] sm:$0xff]  }
  0xca   :  { %596 = vmatpush1.bf16.msra.mxu0 %v1703_v30  ;;  %v1776_v30 = vld [vmem:[#allocation7 + $0x8] sm:$0xff]  }
  0xcd   :  { %598 = vmatmul.mubr.bf16.vlgmr.msra.gmra.mrb[0].mxu0 %v1706_v31  ;;  %v1777_v31 = vld [vmem:[#allocation7 + $0x50] sm:$0xff]  }
 0x1a0   :  { %v599_v45 = vpop.f32.mrb[0].mxu0 }
 0x1a1   :  { %v1589_v46 = vadd.f32 %v599_v45, %v175_v43  ;;  %v601_v47 = vpop.f32.mrb[1].mxu0  ;;  %v1790_v45 = vld [vmem:[#allocation8 + $0x8] sm:$0xff]  }
 0x1a2   :  { %v1590_v48 = vadd.f32 %v601_v47, %v179_v44  ;;  %v603_v49 = vpop.f32.mrb[2].mxu0  ;;  %v1792_v47 = vld [vmem:[#allocation8 + $0x18] sm:$0xff]  }
 0x1a3   :  { %v1591_v50 = vadd.f32 %v603_v49, %v175_v43  ;;  %v605_v51 = vpop.f32.mrb[3].mxu0  ;;  %v608_v53 = vmax.f32 %v1589_v46, 0.0  ;;  %v1789_v43 = vld [vmem:[#allocation8] sm:$0xff]   ;;  %v1791_v46 = vld [vmem:[#allocation8 + $0x10] sm:$0xff]   ;;  %v1794_v49 = vld [vmem:[#allocation8 + $0x28] sm:$0xff]  }
 0x1a4   :  { %v1592_v52 = vadd.f32 %v605_v51, %v179_v44  ;;  %v609_v55 = vmax.f32 %v1590_v48, 0.0  ;;  %v1903_v44 = vmov 0.0   ;;  %v1793_v48 = vld [vmem:[#allocation8 + $0x20] sm:$0xff]  }
 0x1a5   :  { %v610_v54 = vmax.f32 %v1591_v50, 0.0  ;;  %1569 = vmatprep.subr.bf16.mxu0 %v1903_v44  ;;  %1585 = vmatprep.mubr.msk.bf16.mxu0 %vm1904_vm0, %v1903_v44 }
 0x1a6   :  { %v611_v56 = vmax.f32 %v1592_v52, 0.0  ;;  %1570 = vmatpush3.bf16.msra.mxu0 %v1789_v43 }
 0x1a7   :  { %v612_v57 = vpack.c.bf16 %v610_v54, %v608_v53  ;;  %1571 = vmatprep.subr.bf16.mxu0 %v1903_v44  ;;  %v1470_v54 = vld [vmem:[%s2120_s6] ss:$0 sm:$0xff] }
 0x1a8   :  { %v613_v58 = vpack.c.bf16 %v611_v56, %v609_v55 }
 0x1aa   :  { %850 = vmatprep.mubr.bf16.mxu1 %v613_v58  ;;  %1572 = vmatpush3.bf16.msra.mxu0 %v1790_v45 }
 0x1ab   :  { %851 = vmatmul.mubr.bf16.vlgmr.msra.gmra.mrb[0].mxu1 %v612_v57  ;;  %1573 = vmatprep.subr.bf16.mxu0 %v1903_v44 }
 0x1ac   :  { %1517 = vmatpush3.bf16.msra.mxu1 %v1758_v59 }
 0x1ad   :  { %1518 = vmatprep.subr.bf16.mxu1 %v1759_v60 }
 0x1ae   :  { %1574 = vmatpush3.bf16.msra.mxu0 %v1791_v46 }
 0x1af   :  { %1575 = vmatprep.subr.bf16.mxu0 %v1903_v44 }
 0x1b0   :  { %1519 = vmatpush3.bf16.msra.mxu1 %v1760_v61 }
 0x1b1   :  { %1520 = vmatprep.subr.bf16.mxu1 %v1761_v62 }
 0x1b2   :  { %1576 = vmatpush3.bf16.msra.mxu0 %v1792_v47 }
 0x1b3   :  { %1577 = vmatprep.subr.bf16.mxu0 %v1903_v44 }
 0x1b4   :  { %1521 = vmatpush3.bf16.msra.mxu1 %v1762_v63 }
 0x1b5   :  { %1522 = vmatprep.subr.bf16.mxu1 %v1763_v0  ;;  %v1795_v0 = vld [vmem:[#allocation8 + $0x30] sm:$0xff]  }
 0x1b6   :  { %1578 = vmatpush3.bf16.msra.mxu0 %v1793_v48 }
 0x1b7   :  { %1579 = vmatprep.subr.bf16.mxu0 %v1903_v44 }
 0x1b8   :  { %1523 = vmatpush3.bf16.msra.mxu1 %v1764_v1  ;;  %v1796_v1 = vld [vmem:[#allocation8 + $0x38] sm:$0xff]  }
 0x1b9   :  { %1524 = vmatprep.subr.bf16.mxu1 %v1765_v2 }
 0x1ba   :  { %1580 = vmatpush3.bf16.msra.mxu0 %v1794_v49 }
 0x1bb   :  { %1581 = vmatprep.subr.bf16.mxu0 %v1903_v44 }
 0x1bc   :  { %1525 = vmatpush3.bf16.msra.mxu1 %v1766_v3  ;;  %v1487_v3 = vld [vmem:[%s2122_s8] ss:$0 sm:$0xff] }
 0x1bd   :  { %1526 = vmatprep.subr.bf16.mxu1 %v1767_v4 }
 0x1be   :  { %1582 = vmatpush3.bf16.msra.mxu0 %v1795_v0 }
 0x1bf   :  { %1583 = vmatprep.subr.bf16.mxu0 %v1903_v44 }
 0x1c0   :  { %1527 = vmatpush3.bf16.msra.mxu1 %v1768_v5 }
 0x1c1   :  { %1528 = vmatprep.subr.bf16.mxu1 %v1769_v6 }
 0x1c2   :  { %1584 = vmatpush3.bf16.msra.mxu0 %v1796_v1 }
 0x1c4   :  { %1529 = vmatpush3.bf16.msra.mxu1 %v1770_v7 }
 0x1c5   :  { %1530 = vmatprep.subr.bf16.mxu1 %v1771_v8 }
 0x1c8   :  { %1531 = vmatpush3.bf16.msra.mxu1 %v1772_v9 }
 0x1c9   :  { %1538 = vmatprep.subr.bf16.mxu1 %v1773_v10 }
 0x27e   :  { %v852_v14 = vpop.f32.mrb[0].mxu1 }
 0x27f   :  { %v853_v15 = vadd.f32 %v852_v14, %v651_v12  ;;  %v854_v16 = vpop.f32.mrb[1].mxu1 }
 0x280   :  { %v855_v17 = vadd.f32 %v854_v16, %v655_v13  ;;  %v856_v18 = vpop.f32.mrb[2].mxu1  ;;  %v1513_v16 = vld [vmem:[%s2125_s11] ss:$0 sm:$0xff] }
 0x281   :  { %v857_v19 = vadd.f32 %v856_v18, %v651_v12  ;;  %v858_v20 = vpop.f32.mrb[3].mxu1  ;;  %v861_v22 = vmax.f32 %v853_v15, 0.0 }
 0x282   :  { %v859_v21 = vadd.f32 %v858_v20, %v655_v13  ;;  %v862_v24 = vmax.f32 %v855_v17, 0.0  ;;  %v1514_v20 = vld [vmem:[#allocation2] ss:$0 sm:$0xff] }
 0x283   :  { %v863_v23 = vmax.f32 %v857_v19, 0.0 }
 0x284   :  { %v864_v25 = vmax.f32 %v859_v21, 0.0 }
 0x285   :  { %v865_v26 = vpack.c.bf16 %v863_v23, %v861_v22 }
 0x286   :  { %v866_v27 = vpack.c.bf16 %v864_v25, %v862_v24 }
 0x288   :  { %1034 = vmatprep.mubr.bf16.mxu1 %v866_v27 }
 0x289   :  { %1035 = vmatmul.mubr.bf16.vlgmr.msra.gmra.mrb[4].mxu1 %v865_v26 }
 0x28a   :  { %1539 = vmatpush3.bf16.msra.mxu1 %v1774_v28 }
 0x28b   :  { %1540 = vmatprep.subr.bf16.mxu1 %v1775_v29 }
 0x28e   :  { %1541 = vmatpush3.bf16.msra.mxu1 %v1776_v30 }
 0x28f   :  { %1542 = vmatprep.subr.bf16.mxu1 %v1777_v31 }
 0x292   :  { %1543 = vmatpush3.bf16.msra.mxu1 %v1778_v32 }
 0x293   :  { %1544 = vmatprep.subr.bf16.mxu1 %v1779_v33 }
 0x296   :  { %1545 = vmatpush3.bf16.msra.mxu1 %v1780_v34 }
 0x297   :  { %1546 = vmatprep.subr.bf16.mxu1 %v1781_v35 }
 0x29a   :  { %1547 = vmatpush3.bf16.msra.mxu1 %v1782_v36 }
 0x29b   :  { %1548 = vmatprep.subr.bf16.mxu1 %v1783_v37 }
 0x29e   :  { %1549 = vmatpush3.bf16.msra.mxu1 %v1784_v38 }
 0x29f   :  { %1550 = vmatprep.subr.bf16.mxu1 %v1785_v39 }
 0x2a2   :  { %1551 = vmatpush3.bf16.msra.mxu1 %v1786_v40 }
 0x2a3   :  { %1552 = vmatprep.subr.bf16.mxu1 %v1787_v41 }
 0x2a6   :  { %1553 = vmatpush3.bf16.msra.mxu1 %v1788_v42 }
 0x35c   :  { %v1532_v50 = vpop.f32.mrb[4].mxu1 }
 0x35d   :  { %v1533_v51 = vpop.f32.mrb[5].mxu1 }
 0x35e   :  { %v1534_v52 = vadd.f32 %v1533_v51, %v1532_v50  ;;  %v1535_v53 = vpop.f32.mrb[6].mxu1 }
 0x35f   :  { %v1536_v55 = vpop.f32.mrb[7].mxu1 }
 0x360   :  { %v1537_v56 = vadd.f32 %v1536_v55, %v1535_v53  ;;  %v1037_v57 = vadd.f32 %v1534_v52, %v1470_v54 }
 0x362   :  { %v1040_v58 = vadd.f32 %v1537_v56, %v1470_v54 }
 0x364   :  { %v1043_v59 = vsub.f32 %v1037_v57, %v1040_v58  ;;  %v1046_v60 = vmul.f32 %v1040_v58, %v1037_v57 }
 0x366   :  { %v1044_v61 = vand.u32 2147483647, %v1043_v59  ;;  %v1047_v62 = vpack.c.bf16 %v1046_v60, %v1046_v60 }
 0x368   :  { %v1045_v63 = vpack.c.bf16 %v1044_v61, %v1044_v61  ;;  %1215 = vmatprep.mubr.bf16.mxu1 %v1047_v62 }
 0x36a   :  { %1216 = vmatmul.mubr.bf16.vlgmr.msra.gmra.mrb[8].mxu1 %v1045_v63 }
 0x43d   :  { %v1554_v2 = vpop.f32.mrb[8].mxu1 }
 0x43e   :  { %v1555_v4 = vpop.f32.mrb[9].mxu1 }
 0x43f   :  { %v1556_v5 = vadd.f32 %v1555_v4, %v1554_v2  ;;  %v1557_v6 = vpop.f32.mrb[10].mxu1 }
 0x440   :  { %v1558_v7 = vpop.f32.mrb[11].mxu1 }
 0x441   :  { %v1218_v8 = vadd.f32 %v1556_v5, %v1487_v3 }
 0x443   :  { %v1223_v9 = vmax.f32 %v1218_v8, 0.0 }
 0x445   :  { %v1224_v10 = vpack.c.bf16 %v1223_v9, %v1223_v9 }
 0x447   :  { %1586 = vmatmul.mubr.bf16.vlgmr.msra.gmra.mrb[4].mxu0 %v1224_v10 }
 0x51a   :  { %v1330_v12 = vpop.f32.mrb[4].mxu0 }
 0x51b   :  { %v1331_v13 = vadd.f32 %v1504_v11, %v1330_v12  ;;  %v1587_v14 = vpop.f32.mrb[5].mxu0 }
 0x51c   :  { %v1333_v15 = vpop.f32.mrb[6].mxu0 }
 0x51d   :  { %v1336_v17 = vmax.f32 %v1331_v13, 0.0  ;;  %v1588_v18 = vpop.f32.mrb[7].mxu0 }
 0x51f   :  { %v1344_v19 = vmul.f32 %v1513_v16, %v1336_v17 }
 0x521   :  { %1345 = vadd.xlane.f32.xlu0 %v1344_v19 }
 0x5ae   :  { %v1346_v21 = vpop.xlane.xlu0 %1345 }
 0x5af   :  { %v1354_v22 = vadd.f32 %v1514_v20, %v1346_v21 }
 0x5b1   :  { %v1515_v23 = vmul.f32 -1.442695, %v1354_v22 }
 0x5b3   :  { %1797 = vpow2.f32 %v1515_v23 }
 0x5bd   :  { %v1798_v24 = vpop.eup %1797 }
 0x5be   :  { %v1358_v25 = vadd.f32 1.0, %v1798_v24 }
 0x5c0   :  { %1799 = vrcp.f32 %v1358_v25 }
 0x5ca   :  { %v1800_v26 = vpop.eup %1799 }
 0x5cb   :  { %1362 = vst.msk [vmem:[%s2127_s13] sm:$0xff] %vm1361_vm1, %v1800_v26 }
 0x5cc   :  { %1367 = vsyncpa [#allocation4], 1 }
 0x5cd   :  { %1368 = vsyncpa [#allocation6], 1 }
 0x5ce   :  { %1369 = vsyncpa [#allocation9], 1 }

</bundles_post_ra>
